<compile_context>
chip_gen: v6e
topology: v6e:2x2x1
jax: 0.10.0
libtpu: 0.0.40
codegen_flags: <defaults>
</compile_context>

<pallas_src>
import functools
import math

import jax
import jax.numpy as jnp
from jax.experimental import pallas as pl
from jax.experimental.pallas import tpu as pltpu

LANE = 128


# --------------------------------------------------------------------------
# Kernels
# --------------------------------------------------------------------------
def _sca_fused_kernel(x_ref, w_ref, b_ref, o_ref, *, inv_hw):
    # x_ref: (1, C, S, 128)  w_ref: (C, C) f32  b_ref: (C, 1) f32  o_ref like x_ref
    x = x_ref[0]                                              # (C, S, 128), input dtype
    # Global average pool: f32-accumulated sum over padded spatial (zeros in the
    # padding contribute nothing), divided by the true H*W.
    part = jnp.sum(x, axis=2, dtype=jnp.float32)              # (C, S)
    mean = jnp.sum(part, axis=1) * inv_hw                     # (C,)
    # 1x1 conv on the pooled vector as VPU broadcast + lane reduce
    # (avoids a width-1 MXU matmul).
    y = jnp.sum(w_ref[...] * mean[None, :], axis=1, keepdims=True) + b_ref[...]  # (C, 1)
    # Channel reweighting in the input dtype (no f32 copy of the slab).
    o_ref[0] = x * y.astype(x.dtype)[:, :, None]


def _sca_pool_kernel(x_ref, sum_ref):
    # x_ref: (1, C, TS, 128)  sum_ref: (1, C, 1) f32 accumulator
    @pl.when(pl.program_id(1) == 0)
    def _():
        sum_ref[...] = jnp.zeros_like(sum_ref)

    part = jnp.sum(x_ref[0], axis=2, dtype=jnp.float32)       # (C, TS)
    sum_ref[0] += jnp.sum(part, axis=1, keepdims=True)        # (C, 1)


def _sca_scale_kernel(x_ref, y_ref, o_ref):
    # x_ref: (1, C, TS, 128)  y_ref: (1, C, 1) f32  o_ref like x_ref
    x = x_ref[0]
    y = y_ref[0].astype(x.dtype)                              # (C, 1)
    o_ref[0] = x * y[:, :, None]


# --------------------------------------------------------------------------
# Wrappers
# --------------------------------------------------------------------------
def _pad_and_fold(x_nchw, s_pad):
    """(N, C, H, W) -> zero-padded (N, C, s_pad, 128)."""
    N, C, H, W = x_nchw.shape
    HW = H * W
    hw_pad = s_pad * LANE
    x_flat = x_nchw.reshape(N, C, HW)
    if hw_pad != HW:
        x_flat = jnp.pad(x_flat, ((0, 0), (0, 0), (0, hw_pad - HW)))
    return x_flat.reshape(N, C, s_pad, LANE)


def _single_pass(x_nchw, w_f32, b_col):
    N, C, H, W = x_nchw.shape
    HW = H * W
    dtype = x_nchw.dtype
    itemsize = dtype.itemsize
    s = pl.cdiv(HW, LANE)
    hw_pad = s * LANE
    x4 = _pad_and_fold(x_nchw, s)

    block_bytes = C * hw_pad * itemsize
    # ~2 in + 2 out double-buffered blocks + headroom, capped v7x-safe.
    vmem_limit = int(min(max(4 * block_bytes + (4 << 20), 32 << 20), 56 << 20))
    cost = pl.CostEstimate(
        flops=2 * N * C * hw_pad + 2 * N * C * C,
        transcendentals=0,
        bytes_accessed=2 * N * C * hw_pad * itemsize + (C * C + C) * 4,
    )
    kernel = functools.partial(_sca_fused_kernel, inv_hw=1.0 / float(HW))

    out4 = pl.pallas_call(
        kernel,
        out_shape=jax.ShapeDtypeStruct((N, C, s, LANE), dtype),
        grid_spec=pltpu.PrefetchScalarGridSpec(
            num_scalar_prefetch=0,
            grid=(N,),
            in_specs=[
                pl.BlockSpec((1, C, s, LANE), lambda n: (n, 0, 0, 0)),
                pl.BlockSpec((C, C), lambda n: (0, 0)),
                pl.BlockSpec((C, 1), lambda n: (0, 0)),
            ],
            out_specs=pl.BlockSpec((1, C, s, LANE), lambda n: (n, 0, 0, 0)),
        ),
        compiler_params=pltpu.CompilerParams(
            dimension_semantics=("parallel",),
            vmem_limit_bytes=vmem_limit),
        cost_estimate=cost,
    )(x4, w_f32, b_col)

    out_flat = out4.reshape(N, C, hw_pad)[:, :, :HW]
    return out_flat.reshape(N, C, H, W)


def _two_pass(x_nchw, w_f32, b_f32, tile_sublanes):
    N, C, H, W = x_nchw.shape
    HW = H * W
    dtype = x_nchw.dtype
    itemsize = dtype.itemsize

    s_needed = pl.cdiv(HW, LANE)
    if tile_sublanes is None:
        ts = max(8, (2 << 20) // max(1, C * LANE * itemsize))   # ~2 MiB x-blocks
    else:
        ts = tile_sublanes
    ts = max(8, (ts // 8) * 8)
    if ts >= s_needed:
        ts = s_needed
        s_pad = s_needed
    else:
        s_pad = pl.cdiv(s_needed, ts) * ts
    hw_pad = s_pad * LANE
    n_t = s_pad // ts

    x4 = _pad_and_fold(x_nchw, s_pad)

    # Pass 1: exact per-channel sums over spatial tiles (f32 accumulation).
    pool_cost = pl.CostEstimate(
        flops=N * C * hw_pad, transcendentals=0,
        bytes_accessed=N * C * hw_pad * itemsize + N * C * 4)
    sums = pl.pallas_call(
        _sca_pool_kernel,
        out_shape=jax.ShapeDtypeStruct((N, C, 1), jnp.float32),
        grid_spec=pltpu.PrefetchScalarGridSpec(
            num_scalar_prefetch=0,
            grid=(N, n_t),
            in_specs=[pl.BlockSpec((1, C, ts, LANE), lambda n, t: (n, 0, t, 0))],
            out_specs=pl.BlockSpec((1, C, 1), lambda n, t: (n, 0, 0)),
        ),
        compiler_params=pltpu.CompilerParams(
            dimension_semantics=("parallel", "arbitrary")),
        cost_estimate=pool_cost,
    )(x4)

    # Tiny batched 1x1 conv on the pooled means in plain JAX: (N,C)@(C,C)^T + b.
    mean = sums[:, :, 0] * (1.0 / float(HW))          # exact sum / true HW
    y = mean @ w_f32.T + b_f32[None, :]               # (N, C) f32
    y3 = y[:, :, None]                                # (N, C, 1)

    # Pass 2: spatially tiled channel reweighting (multiply in input dtype).
    scale_cost = pl.CostEstimate(
        flops=N * C * hw_pad, transcendentals=0,
        bytes_accessed=2 * N * C * hw_pad * itemsize + N * C * 4)
    out4 = pl.pallas_call(
        _sca_scale_kernel,
        out_shape=jax.ShapeDtypeStruct((N, C, s_pad, LANE), dtype),
        grid_spec=pltpu.PrefetchScalarGridSpec(
            num_scalar_prefetch=0,
            grid=(N, n_t),
            in_specs=[
                pl.BlockSpec((1, C, ts, LANE), lambda n, t: (n, 0, t, 0)),
                pl.BlockSpec((1, C, 1), lambda n, t: (n, 0, 0)),
            ],
            out_specs=pl.BlockSpec((1, C, ts, LANE), lambda n, t: (n, 0, t, 0)),
        ),
        compiler_params=pltpu.CompilerParams(
            dimension_semantics=("parallel", "parallel")),
        cost_estimate=scale_cost,
    )(x4, y3)

    out_flat = out4.reshape(N, C, hw_pad)[:, :, :HW]
    return out_flat.reshape(N, C, H, W)


def sca_forward(x_nchw, weight, bias, *, force_two_pass=False, tile_sublanes=None):
    """SCA forward: x * Conv1x1(GlobalAvgPool(x)).

    x_nchw: (N, C, H, W); weight: (C, C) (Conv2d(C,C,1) weight squeezed); bias: (C,).
    """
    N, C, H, W = x_nchw.shape
    HW = H * W
    itemsize = x_nchw.dtype.itemsize
    w_f32 = weight.astype(jnp.float32)
    b_f32 = bias.astype(jnp.float32)

    hw_pad = pl.cdiv(HW, LANE) * LANE
    block_bytes = C * hw_pad * itemsize
    # Single-pass (one HBM read + one write of x) only if ~4 double-buffered
    # blocks fit a v7x-safe VMEM budget; otherwise pool+scale two-pass.
    fits_single = 4 * block_bytes + (C * C + C) * 4 <= (48 << 20)

    if force_two_pass or not fits_single:
        return _two_pass(x_nchw, w_f32, b_f32, tile_sublanes)
    return _single_pass(x_nchw, w_f32, b_f32.reshape(C, 1))


def sca_reference(x_nchw, weight, bias):
    y = jnp.mean(x_nchw, axis=(2, 3), keepdims=True)          # (N, C, 1, 1)
    y = jnp.einsum('oc,ncij->noij', weight, y) + bias[None, :, None, None]
    return x_nchw * y


if __name__ == "__main__":
    key = jax.random.PRNGKey(0)
    k_x, k_w, k_b, k_x2, k_x3 = jax.random.split(key, 5)

    # Small shapes consistent with the module: batch=2, channels=4, spatial=16.
    N, C, H, W = 2, 4, 16, 16
    x = jax.random.normal(k_x, (N, C, H, W), dtype=jnp.float32)
    bound = 1.0 / math.sqrt(C)   # Conv2d(C, C, 1) default init bound
    weight = jax.random.uniform(k_w, (C, C), jnp.float32, -bound, bound)
    bias = jax.random.uniform(k_b, (C,), jnp.float32, -bound, bound)

    ref = sca_reference(x, weight, bias)

    # Single-pass (default) path.
    out = jax.block_until_ready(sca_forward(x, weight, bias))
    assert out.shape == (N, C, H, W)
    assert jnp.allclose(out, ref, atol=1e-5, rtol=1e-5)

    # Two-pass (pool + scale) path on the same shape.
    out2 = jax.block_until_ready(sca_forward(x, weight, bias, force_two_pass=True))
    assert jnp.allclose(out2, ref, atol=1e-5, rtol=1e-5)

    # Non-128-multiple spatial size exercises the zero-pad + crop path.
    C2 = 8
    x_odd = jax.random.normal(k_x2, (2, C2, 10, 10), dtype=jnp.float32)
    w2 = jax.random.uniform(k_w, (C2, C2), jnp.float32, -0.5, 0.5)
    b2 = jax.random.uniform(k_b, (C2,), jnp.float32, -0.5, 0.5)
    out3 = jax.block_until_ready(sca_forward(x_odd, w2, b2))
    assert jnp.allclose(out3, sca_reference(x_odd, w2, b2), atol=1e-5, rtol=1e-5)

    # Multi-tile two-pass (accumulator over several spatial tiles).
    x_big = jax.random.normal(k_x3, (1, C2, 64, 64), dtype=jnp.float32)
    out4 = jax.block_until_ready(
        sca_forward(x_big, w2, b2, force_two_pass=True, tile_sublanes=8))
    assert jnp.allclose(out4, sca_reference(x_big, w2, b2), atol=1e-5, rtol=1e-5)

    print("KERNEL_OK")
</pallas_src>

<mosaic_0001>
module attributes {stable_mosaic.version = 11 : i64} {
  func.func @_sca_fused_kernel(%arg0: i32, %arg1: memref<1x4x2x128xf32, #tpu.memory_space<vmem>>, %arg2: memref<4x4xf32, #tpu.memory_space<vmem>>, %arg3: memref<4x1xf32, #tpu.memory_space<vmem>>, %arg4: memref<1x4x2x128xf32, #tpu.memory_space<vmem>>) attributes {dimension_semantics = [#tpu.dimension_semantics<parallel>], iteration_bounds = array<i64: 2>, scalar_prefetch = 0 : i64, scratch_operands = 0 : i64, tpu.core_type = #tpu.core_type<tc>, window_params = [{transform_indices = @transform_0, window_bounds = array<i64: 1, 4, 2, 128>}, {pipeline_mode = #tpu.pipeline_mode<synchronous>, transform_indices = @transform_1, window_bounds = array<i64: 4, 4>}, {pipeline_mode = #tpu.pipeline_mode<synchronous>, transform_indices = @transform_2, window_bounds = array<i64: 4, 1>}, {transform_indices = @transform_3, window_bounds = array<i64: 1, 4, 2, 128>}]} {
    %c0 = arith.constant 0 : index
    %c0_0 = arith.constant 0 : index
    %c0_1 = arith.constant 0 : index
    %c0_2 = arith.constant 0 : index
    %0 = vector.load %arg1[%c0, %c0_0, %c0_1, %c0_2] : memref<1x4x2x128xf32, #tpu.memory_space<vmem>>, vector<1x4x2x128xf32>
    %1 = vector.shape_cast %0 : vector<1x4x2x128xf32> to vector<4x2x128xf32>
    %cst = arith.constant dense<0.000000e+00> : vector<4x2xf32>
    %2 = vector.multi_reduction <add>, %1, %cst [2] : vector<4x2x128xf32> to vector<4x2xf32>
    %cst_3 = arith.constant dense<0.000000e+00> : vector<4xf32>
    %3 = vector.multi_reduction <add>, %2, %cst_3 [1] : vector<4x2xf32> to vector<4xf32>
    %cst_4 = arith.constant 3.906250e-03 : f32
    %4 = vector.broadcast %cst_4 : f32 to vector<4xf32>
    %5 = arith.mulf %3, %4 : vector<4xf32>
    %c0_5 = arith.constant 0 : index
    %c0_6 = arith.constant 0 : index
    %6 = vector.load %arg2[%c0_5, %c0_6] : memref<4x4xf32, #tpu.memory_space<vmem>>, vector<4x4xf32>
    %7 = vector.shape_cast %5 : vector<4xf32> to vector<1x4xf32>
    %8 = vector.broadcast %7 : vector<1x4xf32> to vector<4x4xf32>
    %9 = arith.mulf %6, %8 : vector<4x4xf32>
    %cst_7 = arith.constant dense<0.000000e+00> : vector<4xf32>
    %10 = vector.multi_reduction <add>, %9, %cst_7 [1] : vector<4x4xf32> to vector<4xf32>
    %11 = vector.shape_cast %10 : vector<4xf32> to vector<4x1xf32>
    %c0_8 = arith.constant 0 : index
    %c0_9 = arith.constant 0 : index
    %12 = vector.load %arg3[%c0_8, %c0_9] : memref<4x1xf32, #tpu.memory_space<vmem>>, vector<4x1xf32>
    %13 = arith.addf %11, %12 : vector<4x1xf32>
    %14 = vector.shape_cast %13 : vector<4x1xf32> to vector<4x1x1xf32>
    %15 = vector.broadcast %14 : vector<4x1x1xf32> to vector<4x2x128xf32>
    %16 = arith.mulf %1, %15 : vector<4x2x128xf32>
    %c0_10 = arith.constant 0 : index
    %c0_11 = arith.constant 0 : index
    %c0_12 = arith.constant 0 : index
    %c0_13 = arith.constant 0 : index
    %17 = vector.load %arg4[%c0_10, %c0_11, %c0_12, %c0_13] : memref<1x4x2x128xf32, #tpu.memory_space<vmem>>, vector<1x4x2x128xf32>
    %18 = vector.shape_cast %17 : vector<1x4x2x128xf32> to vector<4x2x128xf32>
    %19 = vector.shape_cast %16 : vector<4x2x128xf32> to vector<1x4x2x128xf32>
    tpu.vector_store %arg4[%c0_10, %c0_11, %c0_12, %c0_13], %19 {strides = array<i32>} : memref<1x4x2x128xf32, #tpu.memory_space<vmem>>, vector<1x4x2x128xf32>,
    return
  }
  func.func @transform_0(%arg0: i32) -> (i32, i32, i32, i32) {
    %c0_i32 = arith.constant 0 : i32
    %c0_i32_0 = arith.constant 0 : i32
    %c0_i32_1 = arith.constant 0 : i32
    %c0_i32_2 = arith.constant 0 : i32
    return %arg0, %c0_i32, %c0_i32_0, %c0_i32_1 : i32, i32, i32, i32
  }
  func.func @transform_1(%arg0: i32) -> (i32, i32) {
    %c0_i32 = arith.constant 0 : i32
    %c0_i32_0 = arith.constant 0 : i32
    %c0_i32_1 = arith.constant 0 : i32
    return %c0_i32, %c0_i32_0 : i32, i32
  }
  func.func @transform_2(%arg0: i32) -> (i32, i32) {
    %c0_i32 = arith.constant 0 : i32
    %c0_i32_0 = arith.constant 0 : i32
    %c0_i32_1 = arith.constant 0 : i32
    return %c0_i32, %c0_i32_0 : i32, i32
  }
  func.func @transform_3(%arg0: i32) -> (i32, i32, i32, i32) {
    %c0_i32 = arith.constant 0 : i32
    %c0_i32_0 = arith.constant 0 : i32
    %c0_i32_1 = arith.constant 0 : i32
    %c0_i32_2 = arith.constant 0 : i32
    return %arg0, %c0_i32, %c0_i32_0, %c0_i32_1 : i32, i32, i32, i32
  }
}

</mosaic_0001>

<bundles_post_ra>
// kernel: tpu_custom_call.1
= control target key start
LH: loop header
LB: loop body
LE: loop exit
PB: predicated region body
PF: predicated region fallthrough
CT: control target
= control target key end

     0   :  { %8 = vsyncpa [#allocation3], 0  ;;  %s780_s0 = inlined_call_operand.hbm [shape: f32[2,4,2,128], index: 0, kind: input, shape index: {}]   ;;  %s781_s1 = inlined_call_operand.vmem [shape: f32[4,4], index: 1, kind: input, shape index: {}]   ;;  %s782_s2 = inlined_call_operand.vmem [shape: f32[4,1], index: 2, kind: input, shape index: {}]   ;;  %s783_s3 = inlined_call_operand.hbm [shape: f32[2,4,2,128], index: 3, kind: output, shape index: {}]  }
   0x1   :  { %10 = vsyncpa [#allocation3 + $0x1], 0 }
   0x2   :  { %11 = vsyncpa [#allocation4], 0 }
   0x3   :  { %13 = vsyncpa [#allocation4 + $0x1], 0  ;;  %s600_s12 = smov 0   ;;  %s602_s13 = smov 0  }
   0x4   :  { %s604_s14 = smov 0   ;;  %s606_s15 = smov 0  }
   0x5 LB: > { %s621_s16 = sadd.s32 4294967295, %s570_s15   ;;  %s408_s17 = sadd.s32 4294967294, %s570_s15   ;;  %s570_s15 = sphi %s606_s15, %s798_s15   ;;  %s566_s14 = sphi %s604_s14, %s797_s14   ;;  %s562_s13 = sphi %s602_s13, %s796_s13   ;;  %s558_s12 = sphi %s600_s12, %s795_s12  }
   0x6   : > { %s625_s18 = sadd.s32 1, %s570_s15   ;;  %s26_s19 = sadd.s32 1, %s566_s14 }
   0x7   : > { %s23_s20 = ssub.s32 %s570_s15, %s625_s18  ;;  %p33_p0 = scmp.ne.s32.totalorder %s566_s14, %s562_s13 }
   0x8   : > { %p24_p1 = scmp.eq.s32.totalorder %s23_s20, 0  ;;  %p34_p2 = scmp.eq.s32.totalorder %s570_s15, 0 }
   0x9   : > { %p39_p3 = scmp.ne.s32.totalorder %s562_s13, %s558_s12  ;;  %p40_p4 = scmp.eq.s32.totalorder %s621_s16, 0 }
   0xa   : > { %s637_s21 = scalar_select %p24_p1, %s566_s14, %s26_s19  }
   0xb   : > { %p639_p5 = por %p34_p2, %p33_p0  ;;  %p643_p6 = por %p40_p4, %p39_p3 }
   0xc   : > { %p105_p7 = scmp.eq.s32.totalorder %s621_s16, 1  ;;  %p111_p8 = scmp.eq.s32.totalorder %s408_s17, 1 }
   0xd   : > { %s787_s23 = scalar_select %p643_p6, 1, 0 }
   0xe   : > { %p436_p10 = scmp.lt.s32.totalorder %s570_s15, 2  ;;  %p650_p11 = por %p105_p7, %p33_p0 }
   0xf   : > { %p654_p12 = por %p111_p8, %p39_p3  ;;  %s137_s26 = sand.u32 1, %s566_s14  }
  0x10   : > { %s788_s24 = scalar_select %p650_p11, 1, 0 }
  0x11   : > { %s789_s25 = scalar_select %p654_p12, 1, 0 }
  0x12   : > { %s422_s27 = sshll.u32 %s570_s15, 7  ;;  %s411_s28 = sshll.u32 %s137_s26, 3 }
  0x13   : > { %s663_s4 = scalar_lea.hbm %s780_s0, %s422_s27  ;;  %s141_s5 = scalar_lea.vmem [#allocation2], %s411_s28 }
  0x14   : > { %s148_s6 = sshll.u32 %s141_s5, 4  ;;  %p667_p13 = pnand %p436_p10, %p639_p5  ;;  %s671_s6 = int_to_ptr.vmem [resolvable:$true] %s148_s6 }
  0x15   : > { %s673_s8 = scalar_lea.sflag [#allocation3], %s137_s26  ;;  %s478_s9 = scalar_lea.hbm %s663_s4, 128 }
  0x16   : > { %p479_p0 = scmp.ne.s32.totalorder %s663_s4, %s478_s9  ;;  %p480_p1 = pneg %p667_p13 }
  0x17   : > { %s483_s17 = scalar_lea.hbm %s780_s0, 256  ;;  %p484_p4 = scmp.lt.s32.totalorder %s663_s4, %s780_s0 }
  0x18   : > { %p481_p2 = pnand %p480_p1, %p479_p0  ;;  %p485_p5 = scmp.lt.s32.totalorder %s483_s17, %s478_s9 }
  0x1a   : > { %p482_p3 = pneg %p481_p2  ;;  %p486_p7 = por %p485_p5, %p484_p4 }
  0x1c   : > { %p487_p8 = pnand %p486_p7, %p482_p3 }
  0x1e   : > { %490 = shalt.err (!%p487_p8)
}
  0x1f   : > { %s491_s22 = scalar_lea.vmem %s671_s6, 128  ;;  %s572_s26 = smov [#allocation2]  }
  0x20   : > { %p492_p10 = scmp.ne.s32.totalorder %s671_s6, %s491_s22  ;;  %s496_s27 = sshll.u32 %s572_s26, 4  ;;  %s497_s27 = int_to_ptr.vmem [resolvable:$false] %s496_s27 }
  0x21   : > { %s498_s28 = scalar_lea.vmem %s497_s27, 256  ;;  %p499_p2 = scmp.lt.s32.totalorder %s671_s6, %s497_s27 }
  0x22   : > { %p494_p9 = pnand %p492_p10, %p480_p1  ;;  %p500_p12 = scmp.lt.s32.totalorder %s498_s28, %s491_s22 }
  0x24   : > { %p495_p0 = pneg %p494_p9  ;;  %p501_p11 = por %p500_p12, %p499_p2 }
  0x26   : > { %p502_p6 = pnand %p501_p11, %p495_p0 }
  0x28   : > { %505 = shalt.err (!%p502_p6)
}
  0x29   : > { %s573_s29 = smov 32   ;;  %s574_s30 = smov 2  }
  0x2a   : > { %431 = dma.hbm_to_vmem [thread:$0]  (!%p667_p13), %s663_s4, 128, %s671_s6, %s673_s8, %s573_s29, %s573_s29, %s574_s30  }
  0x2b   : > { %p414_p9 = scmp.ge.s32.totalorder %s570_s15, 1  ;;  %p156_p1 = scmp.lt.s32.totalorder %s570_s15, 3 }
  0x2d   : > { %p157_p3 = pnand %p414_p9, %p156_p1 }
  0x2e   : > { %s697_s5 = sand.u32 (!%p157_p3), 1, %s562_s13   ;;  %p791_p6 = scmp.ne.s32.totalorder (!%p157_p3), %s787_s23, 0 }
  0x2f   : > { %160 = sbr.rel (%p157_p3) target bundleno = 644 (0x284), region = 32  ;;  %s415_s9 = sshll.u32 (!%p157_p3), %s697_s5, 3 }
  0x30   : > { %s163_s10 = scalar_lea.sflag (!%p157_p3), [#allocation3], %s697_s5  ;;  %s166_s11 = scalar_lea.vmem (!%p157_p3), [#allocation2], %s415_s9 }
  0x34   : > { %549 = dma.done.wait (%p791_p6), %s163_s10, 128  }
  0x35   : > { %551 = vsyncadd (%p791_p6), %s163_s10, 4294967168  ;;  %vm193_vm0 = vcmask 1041408   ;;  %v707_v0 = vld [vmem:[%s166_s11] sm:$0x3]  ;;  %v709_v1 = vld [vmem:[%s166_s11 + $0x4] sm:$0x3]  ;;  %v210_v8 = vlaneseq }
  0x36   : > { %v711_v2 = vld [vmem:[%s166_s11 + $0x2] sm:$0x3]  ;;  %v194_v3 = vsel %vm193_vm0, %v707_v0, 0.0  ;;  %v200_v4 = vsel %vm193_vm0, %v709_v1, 0.0  ;;  %v715_v5 = vld [vmem:[%s166_s11 + $0x6] sm:$0x3] }
  0x37   : > { %195 = vadd.xlane.f32.xlu0 %v194_v3  ;;  %201 = vadd.xlane.f32.xlu1 %v200_v4  ;;  %v197_v6 = vsel %vm193_vm0, %v711_v2, 0.0  ;;  %v203_v7 = vsel %vm193_vm0, %v715_v5, 0.0  ;;  %v211_v9 = vand.u32 127, %v210_v8  ;;  %v213_v10 = vshrl.u32 %v210_v8, 7  ;;  %v240_v26 = vld [vmem:[%s781_s1] sm:$0xf] }
  0x38   : > { %vm228_vm1 = vcmask 1041409   ;;  %vm230_vm2 = vcmask 1042434   ;;  %vm232_vm3 = vcmask 1043459   ;;  %vm235_vm4 = vcmask 11264   ;;  %v254_v34 = vld [vmem:[%s782_s2] sm:$0xf] }
  0x39   : > { %v214_v13 = vsub.s32 %v211_v9, %v213_v10  ;;  %vm250_vm5 = vcmask 27648   ;;  %v575_v30 = vmov 0   ;;  %v576_v31 = vmov 1966171168   ;;  %s188_s8 = scalar_lea.vmem [#allocation5], %s415_s9  ;;  %s423_s19 = sshll.u32 %s621_s16, 7 }
  0x3a   : > { %476 = vset.pattern.permute.xlu0 %v575_v30  ;;  %477 = vset.pattern.permute.xlu1 %v575_v30  ;;  %v258_v32 = vunpack.c.l.s4 %v576_v31  ;;  %v283_v39 = vsub.s32 0, %v213_v10  ;;  %s335_s17 = sshll.u32 %s188_s8, 4  ;;  %s736_s26 = scalar_lea.hbm %s783_s3, %s423_s19  ;;  %s731_s17 = int_to_ptr.vmem [resolvable:$true] %s335_s17 }
  0x3b   : > { %198 = vadd.xlane.f32.xlu0 %v197_v6  ;;  %204 = vadd.xlane.f32.xlu1 %v203_v7  ;;  %s322_s27 = scalar_lea.sflag [#allocation4], %s697_s5  ;;  %s506_s28 = scalar_lea.vmem %s731_s17, 128 }
  0x3c   : > { %v259_v33 = vunpack.c.0.s8 %v258_v32  ;;  %p507_p11 = scmp.ne.s32.totalorder %s731_s17, %s506_s28  ;;  %p792_p12 = scmp.ne.s32.totalorder %s788_s24, 0 }
  0x3d   : > { %s577_s16 = smov [#allocation5]  }
  0x3e   : > { %v262_v35 = vsub.s32 %v259_v33, %v213_v10  ;;  %p508_p13 = pnand %p507_p11, %p792_p12  ;;  %s510_s29 = sshll.u32 %s577_s16, 4  ;;  %s511_s29 = int_to_ptr.vmem [resolvable:$false] %s510_s29 }
  0x3f   : > { %s512_s30 = scalar_lea.vmem %s511_s29, 256  ;;  %p513_p5 = scmp.lt.s32.totalorder %s731_s17, %s511_s29 }
  0x40   : > { %p509_p4 = pneg %p508_p13  ;;  %p514_p7 = scmp.lt.s32.totalorder %s512_s30, %s506_s28 }
  0x42   : > { %p515_p8 = por %p514_p7, %p513_p5 }
  0x44   : > { %p516_p10 = pnand %p515_p8, %p509_p4 }
  0xc0   : > { %v196_v11 = vpop.xlane.xlu0 %195  ;;  %v202_v12 = vpop.xlane.xlu1 %201 }
  0xc1   : > { %v215_v16 = vrot.slane %v196_v11, %v214_v13  ;;  %v223_v19 = vrot.slane %v202_v12, %v214_v13 }
  0xc4   : > { %v199_v14 = vpop.xlane.xlu0 %198  ;;  %v205_v15 = vpop.xlane.xlu1 %204 }
  0xc5   : > { %v219_v17 = vrot.slane %v199_v14, %v214_v13  ;;  %v227_v18 = vrot.slane %v205_v15, %v214_v13 }
  0xc7   : > { %v229_v20 = vsel %vm228_vm1, %v219_v17, %v215_v16 }
  0xc8   : > { %v231_v21 = vsel %vm230_vm2, %v223_v19, %v229_v20 }
  0xc9   : > { %v233_v22 = vsel %vm232_vm3, %v227_v18, %v231_v21 }
  0xca   : > { %v236_v23 = vsel %vm235_vm4, %v233_v22, 0.0 }
  0xcb   : > { %237 = vadd.xlane.f32.xlu0 %v236_v23 }
 0x154   : > { %v238_v24 = vpop.xlane.xlu0 %237 }
 0x155   : > { %v239_v25 = vmul.f32 0.00390625, %v238_v24 }
 0x157   : > { %v245_v27 = vrot.slane %v239_v25, %v214_v13 }
 0x159   : > { %v249_v28 = vmul.f32 %v245_v27, %v240_v26 }
 0x15b   : > { %v251_v29 = vsel %vm250_vm5, %v249_v28, 0.0 }
 0x15c   : > { %252 = vadd.xlane.f32.xlu1 %v251_v29 }
 0x1e5   : > { %v253_v36 = vpop.xlane.xlu1 %252 }
 0x1e6   : > { %v255_v37 = vadd.f32 %v254_v34, %v253_v36 }
 0x1e8   : > { %v263_v38 = vrot.slane %v255_v37, %v262_v35 }
 0x1ea   : > { %v264_v40 = vcombine.high %v263_v38, %v263_v38  ;;  %v271_v41 = vrot.slane %v263_v38, %v262_v35 }
 0x1ec   : > { %v284_v42 = vrot.slane %v271_v41, %v283_v39  ;;  %v278_v43 = vrot.slane %v264_v40, %v262_v35  ;;  %v279_v45 = vcombine.high %v271_v41, %v271_v41 }
 0x1ee   : > { %298 = vperm.xlu0 %476, %v284_v42   ;;  %v288_v44 = vrot.slane %v278_v43, %v283_v39  ;;  %v292_v46 = vrot.slane %v279_v45, %v283_v39  ;;  %v280_v47 = vcombine.high %v278_v43, %v278_v43 }
 0x1f0   : > { %302 = vperm.xlu1 %477, %v288_v44   ;;  %v296_v48 = vrot.slane %v280_v47, %v283_v39 }
 0x1f4   : > { %306 = vperm.xlu1 %477, %v292_v46  }
 0x1f8   : > { %310 = vperm.xlu1 %477, %v296_v48  }
 0x269   : > { %v299_v49 = vpop.permute.xlu0 %298 }
 0x26a   : > { %v313_v50 = vmul.f32 %v299_v49, %v707_v0 }
 0x26b   : > { %v303_v51 = vpop.permute.xlu1 %302 }
 0x26c   : > { %317 = vst [vmem:[%s188_s8] sm:$0x3] %v313_v50  ;;  %v314_v52 = vmul.f32 %v303_v51, %v711_v2 }
 0x26e   : > { %318 = vst [vmem:[%s188_s8 + $0x2] sm:$0x3] %v314_v52 }
 0x26f   : > { %v307_v53 = vpop.permute.xlu1 %306 }
 0x270   : > { %v315_v54 = vmul.f32 %v307_v53, %v709_v1 }
 0x272   : > { %319 = vst [vmem:[%s188_s8 + $0x4] sm:$0x3] %v315_v54 }
 0x273   : > { %v311_v55 = vpop.permute.xlu1 %310 }
 0x274   : > { %v316_v56 = vmul.f32 %v311_v55, %v715_v5 }
 0x276   : > { %320 = vst [vmem:[%s188_s8 + $0x6] sm:$0x3] %v316_v56 }
 0x277   : > { %519 = shalt.err (!%p516_p10)
}
 0x278   : > { %s520_s9 = scalar_lea.hbm %s736_s26, 128  ;;  %s524_s23 = scalar_lea.hbm %s783_s3, 256 }
 0x279   : > { %p521_p0 = scmp.ne.s32.totalorder %s736_s26, %s520_s9  ;;  %p525_p1 = scmp.lt.s32.totalorder %s736_s26, %s783_s3 }
 0x27a   : > { %p526_p3 = scmp.lt.s32.totalorder %s524_s23, %s520_s9 }
 0x27b   : > { %p522_p2 = pnand %p521_p0, %p792_p12 }
 0x27c   : > { %p527_p6 = por %p526_p3, %p525_p1 }
 0x27d   : > { %p523_p9 = pneg %p522_p2 }
 0x27f   : > { %p528_p11 = pnand %p527_p6, %p523_p9 }
 0x281   : > { %531 = shalt.err (!%p528_p11)
}
 0x282   : > { %s578_s7 = smov 32   ;;  %s579_s8 = smov 2  }
 0x283   : > { %426 = dma.vmem_to_hbm [thread:$0]  (%p792_p12), %s731_s17, 128, %s736_s26, %s322_s27, %s578_s7, %s578_s7, %s579_s8  }
 0x284 PF: > { %s350_s19 = sand.u32 1, %s558_s12   ;;  %p793_p13 = scmp.ne.s32.totalorder %s789_s25, 0 }
 0x285   : > { %p794_p4 = scmp.ge.s32.totalorder %s570_s15, 2  ;;  %s351_s20 = scalar_lea.sflag [#allocation4], %s350_s19 }
 0x287   : > { %p433_p5 = pnand %p794_p4, %p793_p13 }
 0x289   : > { %p434_p7 = pneg %p433_p5 }
 0x28b   : > { %553 = dma.done.wait (%p434_p7), %s351_s20, 128  }
 0x28c   : > { %555 = vsyncadd (%p434_p7), %s351_s20, 4294967168  ;;  %p16_p8 = scmp.ge.s32.totalorder %s625_s18, 4   ;;  %s795_s12 = smov %s562_s13 }
 0x28d   : > { %s796_s13 = smov %s566_s14  ;;  %s797_s14 = smov %s637_s21 }
 0x28e   : > { %s798_s15 = smov %s625_s18  ;;  %18 = sbr.rel (!%p16_p8) target bundleno = 5 (0x5), region = 77 }
 0x293   :  { %356 = vsyncpa [#allocation3], 1 }
 0x294   :  { %358 = vsyncpa [#allocation3 + $0x1], 1 }
 0x295   :  { %359 = vsyncpa [#allocation4], 1 }
 0x296   :  { %361 = vsyncpa [#allocation4 + $0x1], 1 }

</bundles_post_ra>
